<compile_context>
chip_gen: v5e
topology: v5e:2x2
jax: 0.10.0
libtpu: 0.0.40
codegen_flags: <defaults>
</compile_context>

<pallas_src>
import functools

import jax
import jax.numpy as jnp
from jax.experimental import pallas as pl
from jax.experimental.pallas import tpu as pltpu

_LANES = 1024            # lane-dense width (multiple of 128) -> unmasked vector stores
_MAX_ROWS_PER_TILE = 512  # 512*1024*4B = 2 MiB f32 block; in+out double-buffered ~ 8 MiB VMEM


def _copy_kernel(x_ref, o_ref):
    # GradientReverseFunction.forward: output = input * 1.0
    o_ref[...] = x_ref[...]


def _neg_scale_kernel(g_ref, o_ref, *, coeff):
    # GradientReverseFunction.backward: grad_input = -coeff * grad_output
    o_ref[...] = (g_ref[...] * (-coeff)).astype(o_ref.dtype)


def _tiled_elementwise(kernel, x):
    """Run an elementwise Pallas kernel over an arbitrarily-shaped array.

    The array is flattened, padded to a lane-dense 2D slab (rows x 1024) and
    tiled with large (tm, 1024) blocks so each grid step carries many vregs of
    work and the ~0.35us/step pipeline overhead is amortised.
    """
    orig_shape = x.shape
    orig_dtype = x.dtype
    n = x.size

    flat = x.reshape(-1)
    rows = pl.cdiv(n, _LANES)
    # Rows per tile: multiple of 8 (sublane), capped so blocks stay VMEM-friendly
    # on every generation (fits even v5e's 16 MiB scoped default; we raise the
    # limit anyway for headroom).
    tm = min(_MAX_ROWS_PER_TILE, max(8, ((rows + 7) // 8) * 8))
    rows_padded = ((rows + tm - 1) // tm) * tm
    padded_n = rows_padded * _LANES
    if padded_n != n:
        flat = jnp.pad(flat, (0, padded_n - n))
    x2d = flat.reshape(rows_padded, _LANES)

    grid = (rows_padded // tm,)

    out2d = pl.pallas_call(
        kernel,
        out_shape=jax.ShapeDtypeStruct((rows_padded, _LANES), orig_dtype),
        grid_spec=pltpu.PrefetchScalarGridSpec(
            num_scalar_prefetch=0,
            grid=grid,
            in_specs=[pl.BlockSpec((tm, _LANES), lambda i: (i, 0))],
            out_specs=pl.BlockSpec((tm, _LANES), lambda i: (i, 0)),
        ),
        compiler_params=pltpu.CompilerParams(
            dimension_semantics=("parallel",),
            vmem_limit_bytes=64 << 20,
        ),
        cost_estimate=pl.CostEstimate(
            flops=0,
            transcendentals=0,
            bytes_accessed=2 * padded_n * x.dtype.itemsize,
        ),
    )(x2d)

    return out2d.reshape(-1)[:n].reshape(orig_shape)


@functools.partial(jax.custom_vjp, nondiff_argnums=(1,))
def gradient_reverse_layer(x, coeff=1.0):
    """Forward of GradientReverseLayer: identity copy (Pallas kernel)."""
    return _tiled_elementwise(_copy_kernel, x)


def _grl_fwd(x, coeff):
    return gradient_reverse_layer(x, coeff), None


def _grl_bwd(coeff, _residuals, g):
    # Gradient reversal: -coeff * grad_output, also as a Pallas kernel.
    grad_in = _tiled_elementwise(
        functools.partial(_neg_scale_kernel, coeff=float(coeff)), g
    )
    return (grad_in,)


gradient_reverse_layer.defvjp(_grl_fwd, _grl_bwd)


if __name__ == "__main__":
    key = jax.random.PRNGKey(0)
    # Small shapes consistent with the module's usage (activation tensor).
    x = jax.random.normal(key, (2, 4, 16, 16), dtype=jnp.float32)
    coeff = 0.5

    # Forward: identity.
    out = gradient_reverse_layer(x, coeff)
    out = jax.block_until_ready(out)
    assert out.shape == x.shape
    assert jnp.allclose(out, x, atol=0.0, rtol=0.0), "forward must be identity"

    # Backward: reversed, scaled gradient (exercises the second Pallas kernel).
    grad = jax.grad(lambda v: jnp.sum(gradient_reverse_layer(v, coeff)))(x)
    grad = jax.block_until_ready(grad)
    assert jnp.allclose(grad, -coeff * jnp.ones_like(x), atol=1e-6), \
        "backward must be -coeff * grad_output"

    print("KERNEL_OK")
</pallas_src>

<mosaic_0001>
module attributes {stable_mosaic.version = 11 : i64} {
  func.func @_copy_kernel(%arg0: i32, %arg1: memref<8x1024xf32, #tpu.memory_space<vmem>>, %arg2: memref<8x1024xf32, #tpu.memory_space<vmem>>) attributes {dimension_semantics = [#tpu.dimension_semantics<parallel>], iteration_bounds = array<i64: 1>, scalar_prefetch = 0 : i64, scratch_operands = 0 : i64, tpu.core_type = #tpu.core_type<tc>, window_params = [{transform_indices = @transform_0, window_bounds = array<i64: 8, 1024>}, {transform_indices = @transform_1, window_bounds = array<i64: 8, 1024>}]} {
    %c0 = arith.constant 0 : index
    %c0_0 = arith.constant 0 : index
    %0 = vector.load %arg1[%c0, %c0_0] : memref<8x1024xf32, #tpu.memory_space<vmem>>, vector<8x1024xf32>
    %c0_1 = arith.constant 0 : index
    %c0_2 = arith.constant 0 : index
    %1 = vector.load %arg2[%c0_1, %c0_2] : memref<8x1024xf32, #tpu.memory_space<vmem>>, vector<8x1024xf32>
    tpu.vector_store %arg2[%c0_1, %c0_2], %0 {strides = array<i32>} : memref<8x1024xf32, #tpu.memory_space<vmem>>, vector<8x1024xf32>,
    return
  }
  func.func @transform_0(%arg0: i32) -> (i32, i32) {
    %c0_i32 = arith.constant 0 : i32
    %c0_i32_0 = arith.constant 0 : i32
    return %arg0, %c0_i32 : i32, i32
  }
  func.func @transform_1(%arg0: i32) -> (i32, i32) {
    %c0_i32 = arith.constant 0 : i32
    %c0_i32_0 = arith.constant 0 : i32
    return %arg0, %c0_i32 : i32, i32
  }
}

</mosaic_0001>

<bundles_post_ra>
// kernel: tpu_custom_call.1
= control target key start
LH: loop header
LB: loop body
LE: loop exit
PB: predicated region body
PF: predicated region fallthrough
CT: control target
= control target key end

     0   :  { %6 = vsyncpa [#allocation3], 0  ;;  %s128_s0 = inlined_call_operand.hbm [shape: f32[8,1024], index: 0, kind: input, shape index: {}]   ;;  %s129_s1 = inlined_call_operand.hbm [shape: f32[8,1024], index: 1, kind: output, shape index: {}]  }
   0x1   :  { %7 = vsyncpa [#allocation4], 0  ;;  %s13_s8 = sshll.u32 %s128_s0, 4  ;;  %s110_s9 = smov [#allocation2]   ;;  %s14_s8 = int_to_ptr.hbm [resolvable:$true] %s13_s8 }
   0x2   :  { %s15_s10 = sshll.u32 %s110_s9, 4  ;;  %s16_s10 = int_to_ptr.vmem [resolvable:$true] %s15_s10 }
   0x3   :  { %18 = dma.hbm_to_vmem [thread:$0]  %s14_s8, 1024, %s16_s10, [#allocation3]  }
   0x4   :  { %106 = dma.done.wait [#allocation3], 1024  }
   0x5   :  { %107 = vsyncadd [#allocation3], 4294966272  ;;  %v23_v0 = vld [vmem:[#allocation2] sm:$0xff]  ;;  %v24_v1 = vld [vmem:[#allocation2 + $0x8] sm:$0xff]  ;;  %s111_s11 = smov [#allocation5]   ;;  %s46_s14 = sshll.u32 %s129_s1, 4  ;;  %s47_s14 = int_to_ptr.hbm [resolvable:$true] %s46_s14 }
   0x6   :  { %v25_v2 = vld [vmem:[#allocation2 + $0x10] sm:$0xff]  ;;  %31 = vst [vmem:[#allocation5] sm:$0xff] %v23_v0  ;;  %v26_v3 = vld [vmem:[#allocation2 + $0x18] sm:$0xff]  ;;  %v27_v4 = vld [vmem:[#allocation2 + $0x20] sm:$0xff]  ;;  %s44_s12 = sshll.u32 %s111_s11, 4  ;;  %s45_s12 = int_to_ptr.vmem [resolvable:$true] %s44_s12 }
   0x7   :  { %32 = vst [vmem:[#allocation5 + $0x8] sm:$0xff] %v24_v1  ;;  %v28_v5 = vld [vmem:[#allocation2 + $0x28] sm:$0xff]  ;;  %v29_v6 = vld [vmem:[#allocation2 + $0x30] sm:$0xff]  ;;  %v30_v7 = vld [vmem:[#allocation2 + $0x38] sm:$0xff] }
   0x8   :  { %33 = vst [vmem:[#allocation5 + $0x10] sm:$0xff] %v25_v2 }
   0x9   :  { %34 = vst [vmem:[#allocation5 + $0x18] sm:$0xff] %v26_v3 }
   0xa   :  { %35 = vst [vmem:[#allocation5 + $0x20] sm:$0xff] %v27_v4 }
   0xb   :  { %36 = vst [vmem:[#allocation5 + $0x28] sm:$0xff] %v28_v5 }
   0xc   :  { %37 = vst [vmem:[#allocation5 + $0x30] sm:$0xff] %v29_v6 }
   0xd   :  { %38 = vst [vmem:[#allocation5 + $0x38] sm:$0xff] %v30_v7 }
   0xe   :  { %49 = dma.vmem_to_hbm [thread:$0]  %s45_s12, 1024, %s47_s14, [#allocation4]  }
   0xf   :  { %108 = dma.done.wait [#allocation4], 1024  }
  0x10   :  { %109 = vsyncadd [#allocation4], 4294966272 }
  0x11   :  { %54 = vsyncpa [#allocation3], 1 }
  0x12   :  { %55 = vsyncpa [#allocation4], 1 }

</bundles_post_ra>
